<compile_context>
chip_gen: v7x
topology: tpu7x:2x2x1
jax: 0.10.0
libtpu: 0.0.40
codegen_flags: <defaults>
</compile_context>

<pallas_src>
import functools

import jax
import jax.numpy as jnp
from jax.experimental import pallas as pl
from jax.experimental.pallas import tpu as pltpu


def _round_up(v, m):
    return ((v + m - 1) // m) * m


def _oim_matmul_kernel(x_ref, w_ref, out_ref):
    # One MXU matmul per (TM, TN) output tile; F is not tiled, so there is no
    # reduction axis / accumulator to manage.  f32 accumulation regardless of
    # the (possibly bf16) operand dtype.
    out_ref[...] = jnp.dot(
        x_ref[...], w_ref[...], preferred_element_type=jnp.float32
    ).astype(out_ref.dtype)


# Conservative double-buffered VMEM budget: fits v5e's 16 MiB default scoped
# VMEM (smallest of the three generations) with headroom, and trivially fits
# v6e/v7x 32 MiB scoped defaults.
_VMEM_BUDGET_BYTES = 12 * 1024 * 1024
_TM_MAX = 512


def _choose_tn(f_pad, w_itemsize, x_itemsize, n_pad128):
    """Largest lane-dense TN (<= 2048) whose double-buffered tiles fit VMEM."""
    best = 128
    for tn in (2048, 1024, 512, 256, 128):
        vmem = (
            2 * f_pad * tn * w_itemsize        # weight tiles (streamed)
            + 2 * _TM_MAX * f_pad * x_itemsize  # x tile (resident, worst-case TM)
            + 2 * _TM_MAX * tn * 4              # f32 output tiles
        )
        if vmem <= _VMEM_BUDGET_BYTES:
            best = tn
            break
    return min(best, n_pad128)


def _oim_matmul(x_p, w_p, tm, tn):
    b_pad, f_pad = x_p.shape
    _, n_pad = w_p.shape
    grid = (b_pad // tm, n_pad // tn)

    cost = pl.CostEstimate(
        flops=2 * b_pad * f_pad * n_pad,
        transcendentals=0,
        bytes_accessed=(
            x_p.size * x_p.dtype.itemsize
            + w_p.size * w_p.dtype.itemsize
            + b_pad * n_pad * 4
        ),
    )

    return pl.pallas_call(
        _oim_matmul_kernel,
        out_shape=jax.ShapeDtypeStruct((b_pad, n_pad), jnp.float32),
        grid_spec=pltpu.PrefetchScalarGridSpec(
            num_scalar_prefetch=0,
            grid=grid,
            in_specs=[
                # x tile: resident across the N axis (one row tile in practice).
                pl.BlockSpec((tm, f_pad), lambda i, j: (i, 0)),
                # weight tile: streamed along N, double-buffered by Pallas.
                pl.BlockSpec((f_pad, tn), lambda i, j: (0, j)),
            ],
            out_specs=pl.BlockSpec((tm, tn), lambda i, j: (i, j)),
        ),
        compiler_params=pltpu.CompilerParams(
            # Independent output tiles on both axes; with a single B row tile
            # the large N axis is what gets sharded across v7x's two TCs.
            dimension_semantics=("parallel", "parallel"),
        ),
        cost_estimate=cost,
    )(x_p, w_p)


@functools.partial(jax.jit, static_argnames=("n_valid", "tn", "compute_dtype"))
def oim_forward(x, w_padded, n_valid, tn, compute_dtype):
    """Scores = cat(x @ LUT.T, x @ QUEUE.T, axis=1) via one tiled matmul.

    x:        (B, F) features (any float dtype).
    w_padded: (F_pad, N_pad) pre-concatenated/transposed/padded/cast weights.
    n_valid:  C + Q (the unpadded score width).
    """
    b, f = x.shape
    f_pad, n_pad = w_padded.shape

    x = x.astype(compute_dtype)
    sublane = 16 if jnp.dtype(compute_dtype).itemsize < 4 else 8

    # A single row tile whenever B <= 512, so W is streamed exactly once.
    tm = min(_round_up(b, sublane), _TM_MAX)
    b_pad = _round_up(b, tm)

    if (b_pad, f_pad) != (b, f):
        x = jnp.pad(x, ((0, b_pad - b), (0, f_pad - f)))

    out = _oim_matmul(x, w_padded, tm, tn)

    if b_pad != b or n_pad != n_valid:
        out = out[:b, :n_valid]
    return out


class OIMModuleJax:
    """Mirror of the PyTorch OIM_Module (forward only)."""

    def __init__(self, num_class, num_feature, key=None,
                 weight_dtype=jnp.bfloat16):
        self.num_classes = num_class
        self.num_buffer = num_class
        self.num_feature = num_feature
        self.compute_dtype = weight_dtype

        if key is None:
            # PyTorch registers zero-initialized buffers.
            self.LUT = jnp.zeros((self.num_classes, num_feature), jnp.float32)
            self.QUEUE = jnp.zeros((self.num_buffer, num_feature), jnp.float32)
        else:
            # Deterministic random init so the synthetic test exercises the
            # matmul with non-trivial values.
            k1, k2 = jax.random.split(key)
            self.LUT = jax.random.normal(
                k1, (self.num_classes, num_feature), jnp.float32)
            self.QUEUE = jax.random.normal(
                k2, (self.num_buffer, num_feature), jnp.float32)

        # Concat + transpose + pad + cast ONCE: (F_pad, N_pad).  Per-call cost
        # is then a single streamed read of this array.
        w = jnp.transpose(jnp.concatenate([self.LUT, self.QUEUE], axis=0))
        f, n = w.shape
        f_pad = _round_up(f, 128)
        n_pad128 = _round_up(n, 128)
        itemsize = jnp.dtype(weight_dtype).itemsize
        tn = _choose_tn(f_pad, itemsize, itemsize, n_pad128)
        n_pad = _round_up(n, tn)

        w_padded = jnp.zeros((f_pad, n_pad), weight_dtype)
        w_padded = w_padded.at[:f, :n].set(w.astype(weight_dtype))

        self.W_padded = w_padded
        self.N = n
        self.TN = tn

    def __call__(self, x, person_id):
        del person_id  # unused in forward, matching the PyTorch module
        return oim_forward(x, self.W_padded, self.N, self.TN,
                           self.compute_dtype)


if __name__ == "__main__":
    key = jax.random.PRNGKey(0)
    k_mod, k_x, k_id = jax.random.split(key, 3)

    batch = 8
    num_feature = 32
    num_class = 16

    x = jax.random.normal(k_x, (batch, num_feature), jnp.float32)
    person_id = jax.random.randint(k_id, (batch,), 0, num_class)

    # --- f32 weight path: bit-accurate vs the plain-JAX reference -----------
    mod_f32 = OIMModuleJax(num_class, num_feature, key=k_mod,
                           weight_dtype=jnp.float32)
    out_f32 = jax.block_until_ready(mod_f32(x, person_id))

    ref = jnp.concatenate(
        [jnp.dot(x, mod_f32.LUT.T), jnp.dot(x, mod_f32.QUEUE.T)], axis=1
    )
    assert out_f32.shape == (batch, 2 * num_class), out_f32.shape
    assert jnp.allclose(out_f32, ref, atol=1e-5, rtol=1e-5)

    # --- default bf16 weight path: halves the dominant HBM weight stream ----
    mod_bf16 = OIMModuleJax(num_class, num_feature, key=k_mod)
    out_bf16 = jax.block_until_ready(mod_bf16(x, person_id))
    assert out_bf16.shape == (batch, 2 * num_class), out_bf16.shape
    assert jnp.allclose(out_bf16, ref, atol=1e-1, rtol=5e-2)

    print("KERNEL_OK")
</pallas_src>

<mosaic_0001>
module attributes {stable_mosaic.version = 11 : i64} {
  func.func @_oim_matmul_kernel(%arg0: i32, %arg1: i32, %arg2: memref<8x128xf32, #tpu.memory_space<vmem>>, %arg3: memref<128x128xf32, #tpu.memory_space<vmem>>, %arg4: memref<8x128xf32, #tpu.memory_space<vmem>>) attributes {dimension_semantics = [#tpu.dimension_semantics<parallel>, #tpu.dimension_semantics<parallel>], iteration_bounds = array<i64: 1, 1>, scalar_prefetch = 0 : i64, scratch_operands = 0 : i64, tpu.core_type = #tpu.core_type<tc>, window_params = [{transform_indices = @transform_0, window_bounds = array<i64: 8, 128>}, {transform_indices = @transform_1, window_bounds = array<i64: 128, 128>}, {transform_indices = @transform_2, window_bounds = array<i64: 8, 128>}]} {
    %c0 = arith.constant 0 : index
    %c0_0 = arith.constant 0 : index
    %0 = vector.load %arg2[%c0, %c0_0] : memref<8x128xf32, #tpu.memory_space<vmem>>, vector<8x128xf32>
    %c0_1 = arith.constant 0 : index
    %c0_2 = arith.constant 0 : index
    %1 = vector.load %arg3[%c0_1, %c0_2] : memref<128x128xf32, #tpu.memory_space<vmem>>, vector<128x128xf32>
    %cst = arith.constant dense<0.000000e+00> : vector<8x128xf32>
    %2 = tpu.matmul %0, %1, %cst {dimension_numbers = #tpu.dot_dimension_numbers<[1], [0], [0], [1], [0, 0, 1, 1], [], []>} : vector<8x128xf32>, vector<128x128xf32>, vector<8x128xf32> -> vector<8x128xf32>
    %c0_3 = arith.constant 0 : index
    %c0_4 = arith.constant 0 : index
    %3 = vector.load %arg4[%c0_3, %c0_4] : memref<8x128xf32, #tpu.memory_space<vmem>>, vector<8x128xf32>
    tpu.vector_store %arg4[%c0_3, %c0_4], %2 {strides = array<i32>} : memref<8x128xf32, #tpu.memory_space<vmem>>, vector<8x128xf32>,
    return
  }
  func.func @transform_0(%arg0: i32, %arg1: i32) -> (i32, i32) {
    %c0_i32 = arith.constant 0 : i32
    %c0_i32_0 = arith.constant 0 : i32
    return %arg0, %c0_i32 : i32, i32
  }
  func.func @transform_1(%arg0: i32, %arg1: i32) -> (i32, i32) {
    %c0_i32 = arith.constant 0 : i32
    %c0_i32_0 = arith.constant 0 : i32
    return %c0_i32, %arg1 : i32, i32
  }
  func.func @transform_2(%arg0: i32, %arg1: i32) -> (i32, i32) {
    %c0_i32 = arith.constant 0 : i32
    return %arg0, %arg1 : i32, i32
  }
}

</mosaic_0001>

<bundles_post_ra>
// kernel: oim_forward.1
= control target key start
LH: loop header
LB: loop body
LE: loop exit
PB: predicated region body
PF: predicated region fallthrough
CT: control target
= control target key end

     0   :  { %7 = vsyncpa [#allocation3], 0  ;;  %s309_s0 = inlined_call_operand.vmem [shape: f32[8,128], index: 0, kind: input, shape index: {}]   ;;  %s310_s1 = inlined_call_operand.hbm [shape: f32[128,128], index: 1, kind: input, shape index: {}]   ;;  %s311_s2 = inlined_call_operand.hbm [shape: f32[8,128], index: 2, kind: output, shape index: {}]  }
   0x1   :  { %8 = vsyncpa [#allocation4], 0  ;;  %s260_s9 = smov [#allocation2]   ;;  %s212_s13 = scalar_lea.hbm %s310_s1, 2048 }
   0x2   :  { %s16_s10 = sshll.u32 %s260_s9, 4  ;;  %p213_p0 = scmp.ne.s32.totalorder %s310_s1, %s212_s13  ;;  %s17_s10 = int_to_ptr.vmem [resolvable:$true] %s16_s10 }
   0x3   :  { %p216_p1 = scmp.lt.u32.totalorder %s212_s13, %s310_s1 }
   0x5   :  { %p218_p2 = pnand %p216_p1, %p213_p0 }
   0x7   :  { %221 = shalt.err (!%p218_p2)
}
   0x8   :  { %s222_s18 = scalar_lea.vmem %s17_s10, 2048  ;;  %p227_p4 = scmp.lt.s32.totalorder %s17_s10, %s17_s10 }
   0x9   :  { %p223_p3 = scmp.ne.s32.totalorder %s17_s10, %s222_s18  ;;  %p228_p5 = scmp.lt.s32.totalorder %s222_s18, %s222_s18 }
   0xb   :  { %p229_p6 = por %p228_p5, %p227_p4 }
   0xd   :  { %p230_p7 = pnand %p229_p6, %p223_p3 }
   0xf   :  { %233 = shalt.err (!%p230_p7)
}
  0x10   :  { %s261_s19 = smov 128   ;;  %s262_s20 = smov 8  }
  0x11   :  { %22 = dma.hbm_to_vmem [thread:$0]  %s310_s1, 2048, %s17_s10, [#allocation3], %s261_s19, %s261_s19, %s262_s20  }
  0x12   :  { %256 = dma.done.wait [#allocation3], 2048  }
  0x13   :  { %257 = vsyncadd [#allocation3], 4294965248  ;;  %v263_v0 = vmov 0.0|0.0   ;;  %vm264_vm0 = vmmov 0   ;;  %v265_v1 = vmov 0.0   ;;  %v27_v2 = vld [vmem:[#allocation2] sm:$0xff] }
  0x14   :  { %181 = vmatprep.subr.bf16.mxu0 %v263_v0  ;;  %178 = vmatprep.mubr.msk.f32.mxu0 %vm264_vm0, %v265_v1  ;;  %v28_v3 = vld [vmem:[#allocation2 + $0x8] sm:$0xff]  ;;  %v29_v4 = vld [vmem:[#allocation2 + $0x10] sm:$0xff]  ;;  %v30_v6 = vld [vmem:[#allocation2 + $0x18] sm:$0xff]  ;;  %s266_s24 = smov [#allocation5]  }
  0x15   :  { %v182_v5 = vpack.c.bf16 %v28_v3, %v27_v2  ;;  %v185_v7 = vpack.c.bf16 %v30_v6, %v29_v4  ;;  %v31_v8 = vld [vmem:[#allocation2 + $0x20] sm:$0xff]  ;;  %v32_v9 = vld [vmem:[#allocation2 + $0x28] sm:$0xff]  ;;  %v33_v11 = vld [vmem:[#allocation2 + $0x30] sm:$0xff]  ;;  %s120_s25 = sshll.u32 %s266_s24, 4  ;;  %s121_s25 = int_to_ptr.vmem [resolvable:$true] %s120_s25 }
  0x16   :  { %v188_v10 = vpack.c.bf16 %v32_v9, %v31_v8  ;;  %v34_v12 = vld [vmem:[#allocation2 + $0x38] sm:$0xff]  ;;  %v35_v14 = vld [vmem:[#allocation2 + $0x40] sm:$0xff]  ;;  %v36_v15 = vld [vmem:[#allocation2 + $0x48] sm:$0xff]  ;;  %s234_s26 = scalar_lea.vmem %s121_s25, 128  ;;  %p239_p9 = scmp.lt.s32.totalorder %s121_s25, %s121_s25 }
  0x17   :  { %183 = vmatpush3.bf16.msra.mxu0 %v182_v5  ;;  %v191_v13 = vpack.c.bf16 %v34_v12, %v33_v11  ;;  %v194_v16 = vpack.c.bf16 %v36_v15, %v35_v14  ;;  %v37_v17 = vld [vmem:[#allocation2 + $0x50] sm:$0xff]  ;;  %v38_v18 = vld [vmem:[#allocation2 + $0x58] sm:$0xff]  ;;  %v39_v20 = vld [vmem:[#allocation2 + $0x60] sm:$0xff]  ;;  %p235_p8 = scmp.ne.s32.totalorder %s121_s25, %s234_s26  ;;  %p240_p10 = scmp.lt.s32.totalorder %s234_s26, %s234_s26 }
  0x18   :  { %184 = vmatprep.subr.bf16.mxu0 %v263_v0  ;;  %v197_v19 = vpack.c.bf16 %v38_v18, %v37_v17  ;;  %v40_v21 = vld [vmem:[#allocation2 + $0x68] sm:$0xff]  ;;  %v41_v23 = vld [vmem:[#allocation2 + $0x70] sm:$0xff]  ;;  %v42_v24 = vld [vmem:[#allocation2 + $0x78] sm:$0xff] }
  0x19   :  { %v200_v22 = vpack.c.bf16 %v40_v21, %v39_v20  ;;  %v203_v25 = vpack.c.bf16 %v42_v24, %v41_v23  ;;  %v26_v26 = vld [vmem:[%s309_s0] sm:$0xff]  ;;  %p241_p11 = por %p240_p10, %p239_p9 }
  0x1b   :  { %186 = vmatpush3.bf16.msra.mxu0 %v185_v7  ;;  %p242_p12 = pnand %p241_p11, %p235_p8 }
  0x1c   :  { %187 = vmatprep.subr.bf16.mxu0 %v263_v0 }
  0x1f   :  { %189 = vmatpush3.bf16.msra.mxu0 %v188_v10 }
  0x20   :  { %190 = vmatprep.subr.bf16.mxu0 %v263_v0 }
  0x23   :  { %192 = vmatpush3.bf16.msra.mxu0 %v191_v13 }
  0x24   :  { %193 = vmatprep.subr.bf16.mxu0 %v263_v0 }
  0x27   :  { %195 = vmatpush3.bf16.msra.mxu0 %v194_v16 }
  0x28   :  { %196 = vmatprep.subr.bf16.mxu0 %v263_v0 }
  0x2b   :  { %198 = vmatpush3.bf16.msra.mxu0 %v197_v19 }
  0x2c   :  { %199 = vmatprep.subr.bf16.mxu0 %v263_v0 }
  0x2f   :  { %201 = vmatpush3.bf16.msra.mxu0 %v200_v22 }
  0x30   :  { %202 = vmatprep.subr.bf16.mxu0 %v263_v0 }
  0x33   :  { %204 = vmatpush3.bf16.msra.mxu0 %v203_v25 }
  0x36   :  { %179 = vmatmul.mubr.f32.vlgmr.msra.gmra.mrb[0].mxu0 %v26_v26 }
 0x109   :  { %v109_v27 = vpop.f32.mrb[0].mxu0 }
 0x10a   :  { %113 = vst [vmem:[#allocation5] sm:$0xff] %v109_v27  ;;  %v180_v28 = vpop.f32.mrb[1].mxu0 }
 0x10b   :  { %245 = shalt.err (!%p242_p12)
}
 0x10c   :  { %s246_s29 = scalar_lea.hbm %s311_s2, 128 }
 0x10d   :  { %p247_p13 = scmp.ne.s32.totalorder %s311_s2, %s246_s29  ;;  %p250_p0 = scmp.lt.u32.totalorder %s246_s29, %s311_s2 }
 0x10f   :  { %p252_p1 = pnand %p250_p0, %p247_p13 }
 0x111   :  { %255 = shalt.err (!%p252_p1)
}
 0x112   :  { %123 = dma.vmem_to_hbm [thread:$0]  %s121_s25, 128, %s311_s2, [#allocation4]  }
 0x113   :  { %258 = dma.done.wait [#allocation4], 128  }
 0x114   :  { %259 = vsyncadd [#allocation4], 4294967168 }
 0x115   :  { %127 = vsyncpa [#allocation3], 1 }
 0x116   :  { %128 = vsyncpa [#allocation4], 1 }

</bundles_post_ra>
